<compile_context>
chip_gen: v7x
topology: tpu7x:2x2x1
jax: 0.10.0
libtpu: 0.0.40
codegen_flags: <defaults>
</compile_context>

<pallas_src>
import math

import jax
import jax.numpy as jnp
from jax.experimental import pallas as pl
from jax.experimental.pallas import tpu as pltpu

_THRESHOLD = 20.0
_LANE = 128
_MAX_COLS = 4096                        # widest lane-dense column width tried
_TARGET_BLOCK_BYTES = 4 * 1024 * 1024   # ~4 MiB/block; 2 bufs x (in+out) = 16 MiB
_SINGLE_BLOCK_BYTES = 1 * 1024 * 1024   # below this, one block (step overhead dominates)


def _softplus_kernel(x_ref, o_ref):
    x = x_ref[...]
    # f32 / bf16 compute natively (bf16 VPU/EUP on v6e/v7x; v5e promotes in-reg
    # for free under the HBM roofline).  Narrower floats (f16, fp8) are upcast
    # in-register so HBM traffic stays at the narrow width.
    if x.dtype not in (jnp.float32, jnp.bfloat16):
        x = x.astype(jnp.float32)
    safe_x = jnp.minimum(x, _THRESHOLD)             # avoid overflow in exp
    sp = jnp.log1p(jnp.exp(safe_x))
    # TODO(synk): if v7x bundle dumps show the single EUP port binding (2
    # transcendentals/elem vs 3.2 TB/s HBM), replace the mid-range with a
    # cheaper rational approximation while keeping the exact x>20 tail.
    o_ref[...] = jnp.where(x > _THRESHOLD, x, sp).astype(o_ref.dtype)


def _round_up(a: int, b: int) -> int:
    return -(-a // b) * b


def softplus_pallas(x: jax.Array) -> jax.Array:
    """Elementwise numerically-stable softplus over an arbitrarily-shaped float array."""
    orig_shape = x.shape
    orig_dtype = x.dtype

    if not jnp.issubdtype(orig_dtype, jnp.floating):
        raise TypeError(f"softplus_pallas expects a floating dtype, got {orig_dtype}")

    n = int(math.prod(orig_shape)) if orig_shape else 1
    if n == 0:
        return x                                    # empty: nothing to do

    # TODO(synk): float64 has no TPU hardware path; computed in float32.
    if orig_dtype == jnp.float64:
        x = x.astype(jnp.float32)

    io_dtype = x.dtype
    itemsize = jnp.dtype(io_dtype).itemsize
    sub = 32 // itemsize                            # sublane tile: f32->8, bf16/f16->16

    # ---- lane-dense 2D factorization (free reshape, no padding if possible) ----
    flat = x.reshape(-1)
    n_pad = n
    cols = next((c for c in range(min(_MAX_COLS, _round_up(n, _LANE)), 0, -_LANE)
                 if n % c == 0), 0)
    if cols == 0:
        if n * itemsize <= _TARGET_BLOCK_BYTES:
            cols = n                                # small ragged array: one (1, n) full block
        else:
            # Large array whose numel is not a multiple of 128 (rare for NN
            # tensors): minimal pad to a lane multiple, sliced off afterwards.
            cols = _LANE
            n_pad = _round_up(n, cols)
            flat = jnp.pad(flat, (0, n_pad - n))
    rows = n_pad // cols
    x2d = flat.reshape(rows, cols)

    # ---- block / grid selection ------------------------------------------------
    total_bytes = n_pad * itemsize
    max_block_rows = max(sub, (_TARGET_BLOCK_BYTES // (cols * itemsize)) // sub * sub)

    if total_bytes <= _SINGLE_BLOCK_BYTES or rows <= 2 * sub:
        # Tiny tensor: single full-array block (always layout-legal); splitting
        # would cost more in per-step overhead than megacore/pipelining gains.
        block_rows = rows
    else:
        # At least 2 (even) grid steps so v7x can shard across both TensorCores
        # and double-buffering overlaps DMA with compute; each block ~4 MiB.
        nblocks = max(2, pl.cdiv(rows, max_block_rows))
        if nblocks % 2:
            nblocks += 1
        block_rows = min(max_block_rows, _round_up(pl.cdiv(rows, nblocks), sub))

    grid = (pl.cdiv(rows, block_rows),)   # partial last block: reads padded, writes masked

    out2d = pl.pallas_call(
        _softplus_kernel,
        out_shape=jax.ShapeDtypeStruct((rows, cols), io_dtype),
        grid=grid,
        in_specs=[pl.BlockSpec((block_rows, cols), lambda i: (i, 0))],
        out_specs=pl.BlockSpec((block_rows, cols), lambda i: (i, 0)),
        compiler_params=pltpu.CompilerParams(
            # Single streaming axis; "parallel" lets v7x shard it across its
            # two TensorCores (no-op on single-TC v5e/v6e).
            dimension_semantics=("parallel",),
            vmem_limit_bytes=40 * 1024 * 1024,
        ),
    )(x2d)

    out = out2d.reshape(-1)
    if n_pad != n:
        out = out[:n]
    out = out.reshape(orig_shape)
    return out.astype(orig_dtype) if out.dtype != orig_dtype else out


if __name__ == "__main__":
    key = jax.random.PRNGKey(0)
    k1, k2 = jax.random.split(key)

    # Small NCHW input consistent with the module's elementwise forward.
    x = jax.random.normal(k1, (2, 4, 16, 16), dtype=jnp.float32) * 10.0
    y = softplus_pallas(x)
    jax.block_until_ready(y)
    ref = jnp.where(x > _THRESHOLD, x, jnp.log1p(jnp.exp(jnp.minimum(x, _THRESHOLD))))
    assert y.shape == x.shape and y.dtype == x.dtype
    assert jnp.allclose(y, ref, atol=1e-5, rtol=1e-5)

    # Larger input: exercises the multi-block (>= 2, even) grid path.
    x2 = jax.random.normal(k2, (4, 8, 128, 128), dtype=jnp.float32) * 10.0
    y2 = softplus_pallas(x2)
    jax.block_until_ready(y2)
    ref2 = jnp.where(x2 > _THRESHOLD, x2, jnp.log1p(jnp.exp(jnp.minimum(x2, _THRESHOLD))))
    assert jnp.allclose(y2, ref2, atol=1e-5, rtol=1e-5)

    # bf16 stays native end-to-end (no wrapper-side casts).
    x3 = x.astype(jnp.bfloat16)
    y3 = softplus_pallas(x3)
    jax.block_until_ready(y3)
    ref3 = jnp.where(x3 > _THRESHOLD, x3,
                     jnp.log1p(jnp.exp(jnp.minimum(x3, jnp.bfloat16(_THRESHOLD)))))
    assert y3.dtype == jnp.bfloat16
    assert jnp.allclose(y3.astype(jnp.float32), ref3.astype(jnp.float32),
                        atol=2e-2, rtol=2e-2)

    print("KERNEL_OK")
</pallas_src>

<mosaic_0001>
module attributes {stable_mosaic.version = 11 : i64} {
  func.func @_softplus_kernel(%arg0: i32, %arg1: memref<1x2048xf32, #tpu.memory_space<vmem>>, %arg2: memref<1x2048xf32, #tpu.memory_space<vmem>>) attributes {dimension_semantics = [#tpu.dimension_semantics<parallel>], iteration_bounds = array<i64: 1>, scalar_prefetch = 0 : i64, scratch_operands = 0 : i64, tpu.core_type = #tpu.core_type<tc>, window_params = [{transform_indices = @transform_0, window_bounds = array<i64: 1, 2048>}, {transform_indices = @transform_1, window_bounds = array<i64: 1, 2048>}]} {
    %c0 = arith.constant 0 : index
    %c0_0 = arith.constant 0 : index
    %0 = vector.load %arg1[%c0, %c0_0] : memref<1x2048xf32, #tpu.memory_space<vmem>>, vector<1x2048xf32>
    %cst = arith.constant 2.000000e+01 : f32
    %1 = vector.broadcast %cst : f32 to vector<1x2048xf32>
    %2 = arith.minimumf %0, %1 : vector<1x2048xf32>
    %3 = math.exp %2 : vector<1x2048xf32>
    %4 = math.log1p %3 : vector<1x2048xf32>
    %cst_1 = arith.constant 2.000000e+01 : f32
    %5 = vector.broadcast %cst_1 : f32 to vector<1x2048xf32>
    %6 = arith.cmpf ogt, %0, %5 : vector<1x2048xf32>
    %7 = arith.select %6, %0, %4 : vector<1x2048xi1>, vector<1x2048xf32>
    %c0_2 = arith.constant 0 : index
    %c0_3 = arith.constant 0 : index
    %8 = vector.load %arg2[%c0_2, %c0_3] : memref<1x2048xf32, #tpu.memory_space<vmem>>, vector<1x2048xf32>
    tpu.vector_store %arg2[%c0_2, %c0_3], %7 {strides = array<i32>} : memref<1x2048xf32, #tpu.memory_space<vmem>>, vector<1x2048xf32>,
    return
  }
  func.func @transform_0(%arg0: i32) -> (i32, i32) {
    %c0_i32 = arith.constant 0 : i32
    %c0_i32_0 = arith.constant 0 : i32
    return %arg0, %c0_i32 : i32, i32
  }
  func.func @transform_1(%arg0: i32) -> (i32, i32) {
    %c0_i32 = arith.constant 0 : i32
    %c0_i32_0 = arith.constant 0 : i32
    return %arg0, %c0_i32 : i32, i32
  }
}

</mosaic_0001>

<bundles_post_ra>
// kernel: tpu_custom_call.1
= control target key start
LH: loop header
LB: loop body
LE: loop exit
PB: predicated region body
PF: predicated region fallthrough
CT: control target
= control target key end

     0   :  { %6 = vsyncpa [#allocation3], 0  ;;  %s162_s0 = inlined_call_operand.hbm [shape: f32[1,2048], index: 0, kind: input, shape index: {}]   ;;  %s163_s1 = inlined_call_operand.hbm [shape: f32[1,2048], index: 1, kind: output, shape index: {}]  }
   0x1   :  { %7 = vsyncpa [#allocation4], 0  ;;  %s126_s6 = smov [#allocation2]   ;;  %s78_s10 = scalar_lea.hbm %s162_s0, 256 }
   0x2   :  { %s14_s7 = sshll.u32 %s126_s6, 4  ;;  %p79_p0 = scmp.ne.s32.totalorder %s162_s0, %s78_s10  ;;  %s15_s7 = int_to_ptr.vmem [resolvable:$true] %s14_s7 }
   0x3   :  { %p82_p1 = scmp.lt.u32.totalorder %s78_s10, %s162_s0 }
   0x5   :  { %p84_p2 = pnand %p82_p1, %p79_p0 }
   0x7   :  { %87 = shalt.err (!%p84_p2)
}
   0x8   :  { %s88_s15 = scalar_lea.vmem %s15_s7, 256  ;;  %p93_p4 = scmp.lt.s32.totalorder %s15_s7, %s15_s7 }
   0x9   :  { %p89_p3 = scmp.ne.s32.totalorder %s15_s7, %s88_s15  ;;  %p94_p5 = scmp.lt.s32.totalorder %s88_s15, %s88_s15 }
   0xb   :  { %p95_p6 = por %p94_p5, %p93_p4 }
   0xd   :  { %p96_p7 = pnand %p95_p6, %p89_p3 }
   0xf   :  { %99 = shalt.err (!%p96_p7)
}
  0x10   :  { %17 = dma.hbm_to_vmem [thread:$0]  %s162_s0, 256, %s15_s7, [#allocation3]  }
  0x11   :  { %122 = dma.done.wait [#allocation3], 256  }
  0x12   :  { %123 = vsyncadd [#allocation3], 4294967040  ;;  %v21_v0 = vld [vmem:[#allocation2] sm:$0xff]  ;;  %v22_v1 = vld [vmem:[#allocation2 + $0x8] sm:$0xff]  ;;  %s127_s0 = smov [#allocation5]  }
  0x13   :  { %v23_v2 = vmin.f32 %v21_v0, 20.0  ;;  %v24_v3 = vmin.f32 %v22_v1, 20.0  ;;  %vm47_vm1 = vcmp.gt.f32.partialorder %v21_v0, 20.0  ;;  %s59_s18 = sshll.u32 %s127_s0, 4  ;;  %vm48_vm3 = vcmp.gt.f32.partialorder %v22_v1, 20.0  ;;  %s60_s18 = int_to_ptr.vmem [resolvable:$true] %s59_s18 }
  0x14   :  { %s100_s19 = scalar_lea.vmem %s60_s18, 256  ;;  %p105_p9 = scmp.lt.s32.totalorder %s60_s18, %s60_s18 }
  0x15   :  { %v25_v4 = vmul.f32 1.442695, %v23_v2  ;;  %v27_v5 = vmul.f32 1.442695, %v24_v3  ;;  %p101_p8 = scmp.ne.s32.totalorder %s60_s18, %s100_s19  ;;  %p106_p10 = scmp.lt.s32.totalorder %s100_s19, %s100_s19 }
  0x17   :  { %70 = vpow2.f32 %v25_v4  ;;  %p107_p11 = por %p106_p10, %p105_p9 }
  0x18   :  { %72 = vpow2.f32 %v27_v5 }
  0x19   :  { %p108_p12 = pnand %p107_p11, %p101_p8 }
  0x21   :  { %v71_v6 = vpop.eup %70 }
  0x22   :  { %v73_v7 = vpop.eup %72  ;;  %v29_v8 = vadd.f32 1.0, %v71_v6  ;;  %v32_v10 = vmul.f32 -0.5, %v71_v6  ;;  %v35_v13 = vand.u32 2147483647, %v71_v6 }
  0x23   :  { %v38_v9 = vadd.f32 1.0, %v73_v7  ;;  %v41_v11 = vmul.f32 -0.5, %v73_v7  ;;  %v44_v15 = vand.u32 2147483647, %v73_v7 }
  0x24   :  { %74 = vlog2.f32 %v29_v8  ;;  %v33_v12 = vadd.f32 1.0, %v32_v10  ;;  %vm36_vm0 = vcmp.lt.f32.partialorder %v35_v13, 0.0004427343 }
  0x25   :  { %76 = vlog2.f32 %v38_v9  ;;  %v42_v14 = vadd.f32 1.0, %v41_v11  ;;  %vm45_vm2 = vcmp.lt.f32.partialorder %v44_v15, 0.0004427343 }
  0x26   :  { %v34_v16 = vmul.f32 %v71_v6, %v33_v12 }
  0x27   :  { %v43_v18 = vmul.f32 %v73_v7, %v42_v14 }
  0x2e   :  { %v75_v17 = vpop.eup %74 }
  0x2f   :  { %v77_v19 = vpop.eup %76  ;;  %v31_v20 = vmul.f32 0.6931472, %v75_v17 }
  0x30   :  { %v40_v21 = vmul.f32 0.6931472, %v77_v19 }
  0x31   :  { %v37_v22 = vsel %vm36_vm0, %v34_v16, %v31_v20 }
  0x32   :  { %v49_v23 = vsel %vm47_vm1, %v21_v0, %v37_v22  ;;  %v46_v24 = vsel %vm45_vm2, %v43_v18, %v40_v21 }
  0x33   :  { %51 = vst [vmem:[#allocation5] sm:$0xff] %v49_v23  ;;  %v50_v25 = vsel %vm48_vm3, %v22_v1, %v46_v24 }
  0x34   :  { %52 = vst [vmem:[#allocation5 + $0x8] sm:$0xff] %v50_v25 }
  0x35   :  { %111 = shalt.err (!%p108_p12)
}
  0x36   :  { %s112_s22 = scalar_lea.hbm %s163_s1, 256 }
  0x37   :  { %p113_p13 = scmp.ne.s32.totalorder %s163_s1, %s112_s22  ;;  %p116_p0 = scmp.lt.u32.totalorder %s112_s22, %s163_s1 }
  0x39   :  { %p118_p1 = pnand %p116_p0, %p113_p13 }
  0x3b   :  { %121 = shalt.err (!%p118_p1)
}
  0x3c   :  { %62 = dma.vmem_to_hbm [thread:$0]  %s60_s18, 256, %s163_s1, [#allocation4]  }
  0x3d   :  { %124 = dma.done.wait [#allocation4], 256  }
  0x3e   :  { %125 = vsyncadd [#allocation4], 4294967040 }
  0x3f   :  { %66 = vsyncpa [#allocation3], 1 }
  0x40   :  { %67 = vsyncpa [#allocation4], 1 }

</bundles_post_ra>
